<compile_context>
chip_gen: v6e
topology: v6e:2x2x1
jax: 0.10.0
libtpu: 0.0.40
codegen_flags: <defaults>
</compile_context>

<pallas_src>
import functools

import jax
import jax.numpy as jnp
from jax.experimental import pallas as pl
from jax.experimental.pallas import tpu as pltpu


LANE = 128      # TPU vreg lane count (minor dim)
MAX_SUB = 256   # max in-kernel column sub-tile (keeps f32 intermediates in vregs)


def _round_up(x, m):
    return (x + m - 1) // m * m


def _choose_tile(batch, block_b):
    """Lane-dim batch tile: multiple of 128 (or the full batch when tiny),
    capped so the grid has >= 2 steps (v7x megacore) once there is work."""
    if batch <= LANE:
        return batch
    tb = _round_up(min(block_b, batch), LANE)
    if batch > 2 * LANE:
        tb = min(tb, max(LANE, _round_up(pl.cdiv(batch, 2), LANE)))
    return tb


def _pick_sub(tb):
    """Largest 128-multiple column sub-tile <= MAX_SUB that divides tb."""
    if tb <= MAX_SUB:
        return tb
    return MAX_SUB if tb % MAX_SUB == 0 else LANE


def _mlp_kernel(x_ref, w1_ref, b1_ref, w2_ref, b2_ref, w3_ref, b3_ref, o_ref,
                *, sub):
    """Feature-major 3-layer MLP on one (F, tile) batch block.

    x_ref: (F, tile)   w1: (64, F)   w2: (32, 64)   w3: (3, 32)
    b*:    (out, 1) f32              o_ref: (3, tile) f32
    """
    tile = o_ref.shape[-1]
    # Weights / biases: loaded once per grid step (VMEM-resident, tiny).
    w1 = w1_ref[...]
    w2 = w2_ref[...]
    w3 = w3_ref[...]
    b1 = b1_ref[...]
    b2 = b2_ref[...]
    b3 = b3_ref[...]

    # Walk the resident block in small, 128-aligned, lane-dense column slices
    # so per-slice fp32 intermediates ((64, sub) = 16 vregs at sub=256) stay in
    # registers, while the big outer tile amortizes per-grid-step overhead.
    for c0 in range(0, tile, sub):
        xs = x_ref[:, c0:c0 + sub]                                  # (F, sub)
        h1 = jnp.dot(w1, xs, preferred_element_type=jnp.float32)    # (64, sub)
        h1 = jnp.maximum(h1 + b1, 0.0)                              # f32 bias/ReLU
        h2 = jnp.dot(w2, h1.astype(w2.dtype),
                     preferred_element_type=jnp.float32)            # (32, sub)
        h2 = jnp.maximum(h2 + b2, 0.0)
        y = jnp.dot(w3, h2.astype(w3.dtype),
                    preferred_element_type=jnp.float32)             # (3, sub)
        o_ref[:, c0:c0 + sub] = (y + b3).astype(o_ref.dtype)


@functools.partial(jax.jit, static_argnames=("block_b", "use_bf16"))
def tree_health_forward(x, params, *, block_b=4096, use_bf16=True):
    """TreeHealthModel forward: relu(x@W1.T+b1) -> relu(@W2.T+b2) -> @W3.T+b3.

    x:      (B, F) float32
    params: nn.Linear layout — w1 (64, F), b1 (64,), w2 (32, 64), b2 (32,),
            w3 (3, 32), b3 (3,)
    Returns (B, 3) float32.
    """
    B, F = x.shape
    compute_dtype = jnp.bfloat16 if use_bf16 else jnp.float32

    # Feature-major input: batch in the lane dimension. (Ideally produced
    # feature-major upstream so this transpose fuses into the producer.)
    xT = x.T.astype(compute_dtype)                                   # (F, B)

    w1 = params["w1"].astype(compute_dtype)                          # (64, F)
    w2 = params["w2"].astype(compute_dtype)                          # (32, 64)
    w3 = params["w3"].astype(compute_dtype)                          # (3, 32)
    # Biases stay f32: bias-add/ReLU runs in f32 (v5e VPU has no bf16).
    b1 = params["b1"].reshape(-1, 1).astype(jnp.float32)             # (64, 1)
    b2 = params["b2"].reshape(-1, 1).astype(jnp.float32)             # (32, 1)
    b3 = params["b3"].reshape(-1, 1).astype(jnp.float32)             # (3, 1)

    tb = _choose_tile(B, block_b)
    sub = _pick_sub(tb)
    grid = (pl.cdiv(B, tb),)        # no padded copy; last block may be partial

    const = lambda a: pl.BlockSpec(a.shape, lambda i: (0, 0))

    w_bytes = 2 if use_bf16 else 4
    cost = pl.CostEstimate(
        flops=2 * B * (F * 64 + 64 * 32 + 32 * 3),
        transcendentals=0,
        bytes_accessed=(B * F * w_bytes + B * 3 * 4
                        + (64 * F + 32 * 64 + 3 * 32) * w_bytes
                        + (64 + 32 + 3) * 4),
    )

    outT = pl.pallas_call(
        functools.partial(_mlp_kernel, sub=sub),
        out_shape=jax.ShapeDtypeStruct((3, B), jnp.float32),
        grid=grid,
        in_specs=[
            pl.BlockSpec((F, tb), lambda i: (0, i)),  # x streamed over batch lanes
            const(w1), const(b1),                     # weights/biases: VMEM-resident,
            const(w2), const(b2),                     # constant index_map => DMA'd once
            const(w3), const(b3),
        ],
        out_specs=pl.BlockSpec((3, tb), lambda i: (0, i)),  # lane-dense output
        compiler_params=pltpu.CompilerParams(
            dimension_semantics=("parallel",),        # megacore-shard batch on v7x
        ),
        cost_estimate=cost,
    )(xT, w1, b1, w2, b2, w3, b3)

    return outT.T                                     # (B, 3) float32


def init_params(key, input_size):
    """Deterministic init matching nn.Linear: weight (out, in), bias (out,)."""
    ks = jax.random.split(key, 6)

    def u(k, shape, fan_in):
        s = 1.0 / (fan_in ** 0.5)
        return jax.random.uniform(k, shape, jnp.float32, -s, s)

    return {
        "w1": u(ks[0], (64, input_size), input_size),
        "b1": u(ks[1], (64,), input_size),
        "w2": u(ks[2], (32, 64), 64),
        "b2": u(ks[3], (32,), 64),
        "w3": u(ks[4], (3, 32), 32),
        "b3": u(ks[5], (3,), 32),
    }


def reference_forward(x, p):
    h1 = jnp.maximum(x @ p["w1"].T + p["b1"], 0.0)
    h2 = jnp.maximum(h1 @ p["w2"].T + p["b2"], 0.0)
    return h2 @ p["w3"].T + p["b3"]


if __name__ == "__main__":
    key = jax.random.PRNGKey(0)
    kx, kx2, kp = jax.random.split(key, 3)

    input_size = 16
    params = init_params(kp, input_size)

    # 1) Small batch, exact f32 path: single grid step, single sub-slice.
    B = 8
    x = jax.random.normal(kx, (B, input_size), jnp.float32)
    out = jax.block_until_ready(tree_health_forward(x, params, use_bf16=False))
    ref = reference_forward(x, params)
    assert out.shape == (B, 3), out.shape
    assert jnp.allclose(out, ref, atol=1e-4, rtol=1e-4), "f32 small-batch mismatch"

    # 2) Ragged batch, f32 path: 2-step grid + partial last block (no padding).
    B2 = 1000
    x2 = jax.random.normal(kx2, (B2, input_size), jnp.float32)
    out2 = jax.block_until_ready(tree_health_forward(x2, params, use_bf16=False))
    ref2 = reference_forward(x2, params)
    assert out2.shape == (B2, 3), out2.shape
    assert jnp.allclose(out2, ref2, atol=1e-4, rtol=1e-4), "f32 ragged-batch mismatch"

    # 3) Default bf16 streaming path (f32 accumulation): looser tolerance.
    out3 = jax.block_until_ready(tree_health_forward(x2, params))
    assert out3.shape == (B2, 3), out3.shape
    assert jnp.allclose(out3, ref2, atol=3e-2, rtol=3e-2), "bf16 path mismatch"

    print("KERNEL_OK")
</pallas_src>

<mosaic_0001>
module attributes {stable_mosaic.version = 11 : i64} {
  func.func @_mlp_kernel(%arg0: i32, %arg1: memref<16x8xf32, #tpu.memory_space<vmem>>, %arg2: memref<64x16xf32, #tpu.memory_space<vmem>>, %arg3: memref<64x1xf32, #tpu.memory_space<vmem>>, %arg4: memref<32x64xf32, #tpu.memory_space<vmem>>, %arg5: memref<32x1xf32, #tpu.memory_space<vmem>>, %arg6: memref<3x32xf32, #tpu.memory_space<vmem>>, %arg7: memref<3x1xf32, #tpu.memory_space<vmem>>, %arg8: memref<3x8xf32, #tpu.memory_space<vmem>>) attributes {dimension_semantics = [#tpu.dimension_semantics<parallel>], iteration_bounds = array<i64: 1>, scalar_prefetch = 0 : i64, scratch_operands = 0 : i64, tpu.core_type = #tpu.core_type<tc>, window_params = [{transform_indices = @transform_0, window_bounds = array<i64: 16, 8>}, {pipeline_mode = #tpu.pipeline_mode<synchronous>, transform_indices = @transform_1, window_bounds = array<i64: 64, 16>}, {pipeline_mode = #tpu.pipeline_mode<synchronous>, transform_indices = @transform_2, window_bounds = array<i64: 64, 1>}, {pipeline_mode = #tpu.pipeline_mode<synchronous>, transform_indices = @transform_3, window_bounds = array<i64: 32, 64>}, {pipeline_mode = #tpu.pipeline_mode<synchronous>, transform_indices = @transform_4, window_bounds = array<i64: 32, 1>}, {pipeline_mode = #tpu.pipeline_mode<synchronous>, transform_indices = @transform_5, window_bounds = array<i64: 3, 32>}, {pipeline_mode = #tpu.pipeline_mode<synchronous>, transform_indices = @transform_6, window_bounds = array<i64: 3, 1>}, {transform_indices = @transform_7, window_bounds = array<i64: 3, 8>}]} {
    %c0 = arith.constant 0 : index
    %c0_0 = arith.constant 0 : index
    %0 = vector.load %arg2[%c0, %c0_0] : memref<64x16xf32, #tpu.memory_space<vmem>>, vector<64x16xf32>
    %c0_1 = arith.constant 0 : index
    %c0_2 = arith.constant 0 : index
    %1 = vector.load %arg4[%c0_1, %c0_2] : memref<32x64xf32, #tpu.memory_space<vmem>>, vector<32x64xf32>
    %c0_3 = arith.constant 0 : index
    %c0_4 = arith.constant 0 : index
    %2 = vector.load %arg6[%c0_3, %c0_4] : memref<3x32xf32, #tpu.memory_space<vmem>>, vector<3x32xf32>
    %c0_5 = arith.constant 0 : index
    %c0_6 = arith.constant 0 : index
    %3 = vector.load %arg3[%c0_5, %c0_6] : memref<64x1xf32, #tpu.memory_space<vmem>>, vector<64x1xf32>
    %c0_7 = arith.constant 0 : index
    %c0_8 = arith.constant 0 : index
    %4 = vector.load %arg5[%c0_7, %c0_8] : memref<32x1xf32, #tpu.memory_space<vmem>>, vector<32x1xf32>
    %c0_9 = arith.constant 0 : index
    %c0_10 = arith.constant 0 : index
    %5 = vector.load %arg7[%c0_9, %c0_10] : memref<3x1xf32, #tpu.memory_space<vmem>>, vector<3x1xf32>
    %c0_11 = arith.constant 0 : index
    %c0_12 = arith.constant 0 : index
    %6 = vector.load %arg1[%c0_11, %c0_12] : memref<16x8xf32, #tpu.memory_space<vmem>>, vector<16x8xf32>
    %cst = arith.constant dense<0.000000e+00> : vector<64x8xf32>
    %7 = tpu.matmul %0, %6, %cst {dimension_numbers = #tpu.dot_dimension_numbers<[1], [0], [0], [1], [0, 0, 1, 1], [], []>} : vector<64x16xf32>, vector<16x8xf32>, vector<64x8xf32> -> vector<64x8xf32>
    %8 = vector.broadcast %3 : vector<64x1xf32> to vector<64x8xf32>
    %9 = arith.addf %7, %8 : vector<64x8xf32>
    %cst_13 = arith.constant 0.000000e+00 : f32
    %10 = vector.broadcast %cst_13 : f32 to vector<64x8xf32>
    %11 = arith.maximumf %9, %10 : vector<64x8xf32>
    %cst_14 = arith.constant dense<0.000000e+00> : vector<32x8xf32>
    %12 = tpu.matmul %1, %11, %cst_14 {dimension_numbers = #tpu.dot_dimension_numbers<[1], [0], [0], [1], [0, 0, 1, 1], [], []>} : vector<32x64xf32>, vector<64x8xf32>, vector<32x8xf32> -> vector<32x8xf32>
    %13 = vector.broadcast %4 : vector<32x1xf32> to vector<32x8xf32>
    %14 = arith.addf %12, %13 : vector<32x8xf32>
    %cst_15 = arith.constant 0.000000e+00 : f32
    %15 = vector.broadcast %cst_15 : f32 to vector<32x8xf32>
    %16 = arith.maximumf %14, %15 : vector<32x8xf32>
    %cst_16 = arith.constant dense<0.000000e+00> : vector<3x8xf32>
    %17 = tpu.matmul %2, %16, %cst_16 {dimension_numbers = #tpu.dot_dimension_numbers<[1], [0], [0], [1], [0, 0, 1, 1], [], []>} : vector<3x32xf32>, vector<32x8xf32>, vector<3x8xf32> -> vector<3x8xf32>
    %18 = vector.broadcast %5 : vector<3x1xf32> to vector<3x8xf32>
    %19 = arith.addf %17, %18 : vector<3x8xf32>
    %c0_17 = arith.constant 0 : index
    %c0_18 = arith.constant 0 : index
    %20 = vector.load %arg8[%c0_17, %c0_18] : memref<3x8xf32, #tpu.memory_space<vmem>>, vector<3x8xf32>
    tpu.vector_store %arg8[%c0_17, %c0_18], %19 {strides = array<i32>} : memref<3x8xf32, #tpu.memory_space<vmem>>, vector<3x8xf32>,
    return
  }
  func.func @transform_0(%arg0: i32) -> (i32, i32) {
    %c0_i32 = arith.constant 0 : i32
    %c0_i32_0 = arith.constant 0 : i32
    return %c0_i32, %arg0 : i32, i32
  }
  func.func @transform_1(%arg0: i32) -> (i32, i32) {
    %c0_i32 = arith.constant 0 : i32
    %c0_i32_0 = arith.constant 0 : i32
    %c0_i32_1 = arith.constant 0 : i32
    return %c0_i32, %c0_i32_0 : i32, i32
  }
  func.func @transform_2(%arg0: i32) -> (i32, i32) {
    %c0_i32 = arith.constant 0 : i32
    %c0_i32_0 = arith.constant 0 : i32
    %c0_i32_1 = arith.constant 0 : i32
    return %c0_i32, %c0_i32_0 : i32, i32
  }
  func.func @transform_3(%arg0: i32) -> (i32, i32) {
    %c0_i32 = arith.constant 0 : i32
    %c0_i32_0 = arith.constant 0 : i32
    %c0_i32_1 = arith.constant 0 : i32
    return %c0_i32, %c0_i32_0 : i32, i32
  }
  func.func @transform_4(%arg0: i32) -> (i32, i32) {
    %c0_i32 = arith.constant 0 : i32
    %c0_i32_0 = arith.constant 0 : i32
    %c0_i32_1 = arith.constant 0 : i32
    return %c0_i32, %c0_i32_0 : i32, i32
  }
  func.func @transform_5(%arg0: i32) -> (i32, i32) {
    %c0_i32 = arith.constant 0 : i32
    %c0_i32_0 = arith.constant 0 : i32
    %c0_i32_1 = arith.constant 0 : i32
    return %c0_i32, %c0_i32_0 : i32, i32
  }
  func.func @transform_6(%arg0: i32) -> (i32, i32) {
    %c0_i32 = arith.constant 0 : i32
    %c0_i32_0 = arith.constant 0 : i32
    %c0_i32_1 = arith.constant 0 : i32
    return %c0_i32, %c0_i32_0 : i32, i32
  }
  func.func @transform_7(%arg0: i32) -> (i32, i32) {
    %c0_i32 = arith.constant 0 : i32
    %c0_i32_0 = arith.constant 0 : i32
    return %c0_i32, %arg0 : i32, i32
  }
}

</mosaic_0001>

<bundles_post_ra>
// kernel: tree_health_forward.1
= control target key start
LH: loop header
LB: loop body
LE: loop exit
PB: predicated region body
PF: predicated region fallthrough
CT: control target
= control target key end

     0   :  { %vm95_vm0 = vcmask 130048   ;;  %v567_v4 = vmov 0   ;;  %s710_s0 = inlined_call_operand.vmem [shape: f32[16,8], index: 0, kind: input, shape index: {}]   ;;  %s711_s1 = inlined_call_operand.vmem [shape: f32[64,16], index: 1, kind: input, shape index: {}]   ;;  %s712_s2 = inlined_call_operand.vmem [shape: f32[64,1], index: 2, kind: input, shape index: {}]   ;;  %s713_s3 = inlined_call_operand.vmem [shape: f32[32,64], index: 3, kind: input, shape index: {}]   ;;  %s714_s4 = inlined_call_operand.vmem [shape: f32[32,1], index: 4, kind: input, shape index: {}]   ;;  %s715_s5 = inlined_call_operand.vmem [shape: f32[3,32], index: 5, kind: input, shape index: {}]   ;;  %s716_s6 = inlined_call_operand.vmem [shape: f32[3,1], index: 6, kind: input, shape index: {}]   ;;  %s717_s7 = inlined_call_operand.hbm [shape: f32[3,8], index: 7, kind: output, shape index: {}]  }
   0x1   :  { %v54_v0 = vld [vmem:[%s710_s0 + $0x8] sm:$0xff]  ;;  %v53_v1 = vld [vmem:[%s710_s0] sm:$0xff]  ;;  %543 = vset.pattern.permute.xlu0 %v567_v4  ;;  %v29_v5 = vld [vmem:[%s711_s1 + $0x10] sm:$0xff]  ;;  %544 = vset.pattern.permute.xlu1 %v567_v4 }
   0x2   :  { %v27_v2 = vld [vmem:[%s711_s1] sm:$0xff]  ;;  %490 = vmatprep.subr.mxu0 %v54_v0  ;;  %v28_v3 = vld [vmem:[%s711_s1 + $0x8] sm:$0xff]  ;;  %v47_v6 = vld [vmem:[%s712_s2 + $0x38] sm:$0xff] }
   0x3   :  { %494 = vmatprep.mubr.msk.f32.mxu0 %vm95_vm0, %v27_v2  ;;  %491 = vmatpush3.msra.mxu0 %v54_v0  ;;  %v45_v7 = vld [vmem:[%s712_s2 + $0x28] sm:$0xff]  ;;  %v46_v8 = vld [vmem:[%s712_s2 + $0x30] sm:$0xff]  ;;  %v30_v9 = vld [vmem:[%s711_s1 + $0x18] sm:$0xff] }
   0x4   :  { %492 = vmatprep.subr.mxu0 %v53_v1  ;;  %92 = vperm.xlu0 %543, %v47_v6   ;;  %v44_v10 = vld [vmem:[%s712_s2 + $0x20] sm:$0xff] }
   0x5   :  { %493 = vmatpush3.msra.mxu0 %v53_v1  ;;  %82 = vperm.xlu1 %544, %v45_v7   ;;  %v31_v11 = vld [vmem:[%s711_s1 + $0x20] sm:$0xff] }
   0x6   :  { %495 = vmatmul.mubr.msk.f32.vlgmr.msra.gmra.mxu0 %vm95_vm0, %v28_v3 }
   0x7   :  { %497 = vmatprep.mubr.msk.f32.mxu0 %vm95_vm0, %v29_v5 }
   0x8   :  { %12 = vsyncpa [#allocation3], 0  ;;  %87 = vperm.xlu0 %543, %v46_v8   ;;  %v43_v12 = vld [vmem:[%s712_s2 + $0x18] sm:$0xff]  ;;  %v32_v13 = vld [vmem:[%s711_s1 + $0x28] sm:$0xff]  ;;  %vm253_vm1 = vcmask 523264   ;;  %v568_v60 = vmov 0.0  }
   0x9   :  { %77 = vperm.xlu1 %544, %v44_v10   ;;  %v42_v14 = vld [vmem:[%s712_s2 + $0x10] sm:$0xff]  ;;  %v41_v16 = vld [vmem:[%s712_s2 + $0x8] sm:$0xff]  ;;  %v34_v17 = vld [vmem:[%s711_s1 + $0x38] sm:$0xff]  ;;  %528 = vmatprep.subr.mxu0 %v568_v60  ;;  %vm569_vm2 = vmmov 0   ;;  %vm360_vm3 = vcmask 261120   ;;  %s570_s27 = smov [#allocation2]  }
   0xa   :  { %498 = vmatmul.mubr.msk.f32.gmra.mxu0 %vm95_vm0, %v30_v9  ;;  %v33_v15 = vld [vmem:[%s711_s1 + $0x30] sm:$0xff]  ;;  %v40_v18 = vld [vmem:[%s712_s2] sm:$0xff]  ;;  %v51_v19 = vld [vmem:[%s714_s4 + $0x18] sm:$0xff]  ;;  %s442_s28 = sshll.u32 %s570_s27, 4  ;;  %vm434_vm4 = vcmask 59392   ;;  %s443_s28 = int_to_ptr.vmem [resolvable:$true] %s442_s28 }
   0xb   :  { %500 = vmatprep.mubr.msk.f32.mxu0 %vm95_vm0, %v31_v11  ;;  %v50_v20 = vld [vmem:[%s714_s4 + $0x10] sm:$0xff]  ;;  %v49_v21 = vld [vmem:[%s714_s4 + $0x8] sm:$0xff]  ;;  %v48_v22 = vld [vmem:[%s714_s4] sm:$0xff]  ;;  %s545_s29 = scalar_lea.vmem %s443_s28, 64  ;;  %p550_p1 = scmp.lt.s32.totalorder %s443_s28, %s443_s28 }
   0xc   :  { %72 = vperm.xlu0 %543, %v43_v12   ;;  %v52_v23 = vld [vmem:[%s716_s6] sm:$0x7]  ;;  %v36_v57 = vld [vmem:[%s713_s3 + $0x8] sm:$0xff]  ;;  %v37_v58 = vld [vmem:[%s713_s3 + $0x10] sm:$0xff]  ;;  %p546_p0 = scmp.ne.s32.totalorder %s443_s28, %s545_s29  ;;  %p551_p2 = scmp.lt.s32.totalorder %s545_s29, %s545_s29 }
   0xd   :  { %67 = vperm.xlu1 %544, %v42_v14   ;;  %v35_v24 = vld [vmem:[%s713_s3] sm:$0xff]  ;;  %v38_v59 = vld [vmem:[%s713_s3 + $0x18] sm:$0xff] }
   0xe   :  { %501 = vmatmul.mubr.msk.f32.gmra.mxu0 %vm95_vm0, %v32_v13  ;;  %522 = vmatprep.mubr.msk.f32.mxu1 %vm253_vm1, %v35_v24  ;;  %v39_v13 = vld [vmem:[%s715_s5] sm:$0x7]  ;;  %p552_p3 = por %p551_p2, %p550_p1 }
   0xf   :  { %503 = vmatprep.mubr.msk.f32.mxu0 %vm95_vm0, %v33_v15 }
  0x10   :  { %62 = vperm.xlu0 %543, %v41_v16   ;;  %p553_p4 = pnand %p552_p3, %p546_p0 }
  0x11   :  { %57 = vperm.xlu1 %544, %v40_v18  }
  0x12   :  { %504 = vmatmul.mubr.msk.f32.gmra.mxu0 %vm95_vm0, %v34_v17 }
  0x13   :  { %536 = vmatprep.mubr.msk.f32.mxu0 %vm569_vm2, %v568_v60 }
  0x14   :  { %250 = vperm.xlu0 %543, %v51_v19  }
  0x15   :  { %245 = vperm.xlu1 %544, %v50_v20  }
  0x18   :  { %240 = vperm.xlu0 %543, %v49_v21  }
  0x19   :  { %235 = vperm.xlu1 %544, %v48_v22  }
  0x1c   :  { %357 = vperm.xlu0 %543, %v52_v23  }
  0x7f   :  { %v93_v27 = vpop.permute.xlu0 %92 }
  0x80   :  { %v83_v28 = vpop.permute.xlu1 %82 }
  0x83   :  { %v88_v32 = vpop.permute.xlu0 %87 }
  0x84   :  { %v78_v33 = vpop.permute.xlu1 %77 }
  0x87   :  { %v73_v41 = vpop.permute.xlu0 %72 }
  0x88   :  { %v68_v42 = vpop.permute.xlu1 %67 }
  0x8b   :  { %v63_v49 = vpop.permute.xlu0 %62 }
  0x8c   :  { %v58_v50 = vpop.permute.xlu1 %57 }
  0x8f   :  { %v251_v61 = vpop.permute.xlu0 %250 }
  0x90   :  { %v246_v63 = vpop.permute.xlu1 %245 }
  0x93   :  { %v241_v3 = vpop.permute.xlu0 %240 }
  0x94   :  { %v236_v8 = vpop.permute.xlu1 %235 }
  0x97   :  { %v358_v14 = vpop.permute.xlu0 %357 }
  0xc6   :  { %v496_v25 = vpop.f32.mrf.mxu0 }
  0xc7   :  { %v192_v51 = vadd.f32 %v496_v25, %v63_v49 }
  0xc8   :  { %v186_v26 = vpop.f32.mrf.mxu0 }
  0xc9   :  { %v187_v53 = vadd.f32 %v186_v26, %v58_v50  ;;  %v226_v55 = vmax.f32 %v192_v51, 0.0 }
  0xca   :  { %v499_v29 = vpop.f32.mrf.mxu0 }
  0xcb   :  { %v202_v45 = vadd.f32 %v499_v29, %v73_v41  ;;  %v225_v56 = vmax.f32 %v187_v53, 0.0 }
  0xcc   :  { %v196_v30 = vpop.f32.mrf.mxu0 }
  0xcd   :  { %v197_v47 = vadd.f32 %v196_v30, %v68_v42  ;;  %v228_v52 = vmax.f32 %v202_v45, 0.0 }
  0xce   :  { %v502_v31 = vpop.f32.mrf.mxu0 }
  0xcf   :  { %v212_v38 = vadd.f32 %v502_v31, %v83_v28  ;;  %v227_v54 = vmax.f32 %v197_v47, 0.0 }
  0xd0   :  { %v206_v34 = vpop.f32.mrf.mxu0 }
  0xd1   :  { %v207_v43 = vadd.f32 %v206_v34, %v78_v33  ;;  %v230_v46 = vmax.f32 %v212_v38, 0.0 }
  0xd2   :  { %v505_v35 = vpop.f32.mrf.mxu0 }
  0xd3   :  { %v222_v36 = vadd.f32 %v505_v35, %v93_v27  ;;  %v229_v48 = vmax.f32 %v207_v43, 0.0 }
  0xd4   :  { %v216_v37 = vpop.f32.mrf.mxu0 }
  0xd5   :  { %v232_v39 = vmax.f32 %v222_v36, 0.0  ;;  %v217_v40 = vadd.f32 %v216_v37, %v88_v32 }
  0xd7   :  { %v231_v44 = vmax.f32 %v217_v40, 0.0  ;;  %506 = vmatprep.subr.mxu1 %v232_v39 }
  0xd8   :  { %507 = vmatpush3.msra.mxu1 %v232_v39 }
  0xd9   :  { %508 = vmatprep.subr.mxu1 %v231_v44 }
  0xda   :  { %509 = vmatpush3.msra.mxu1 %v231_v44 }
  0xdb   :  { %510 = vmatprep.subr.mxu1 %v230_v46 }
  0xdc   :  { %511 = vmatpush3.msra.mxu1 %v230_v46 }
  0xdd   :  { %512 = vmatprep.subr.mxu1 %v229_v48 }
  0xde   :  { %513 = vmatpush3.msra.mxu1 %v229_v48 }
  0xdf   :  { %514 = vmatprep.subr.mxu1 %v228_v52 }
  0xe0   :  { %515 = vmatpush3.msra.mxu1 %v228_v52 }
  0xe1   :  { %516 = vmatprep.subr.mxu1 %v227_v54 }
  0xe2   :  { %517 = vmatpush3.msra.mxu1 %v227_v54 }
  0xe3   :  { %518 = vmatprep.subr.mxu1 %v226_v55 }
  0xe4   :  { %519 = vmatpush3.msra.mxu1 %v226_v55 }
  0xe5   :  { %520 = vmatprep.subr.mxu1 %v225_v56 }
  0xe6   :  { %521 = vmatpush3.msra.mxu1 %v225_v56 }
  0xe7   :  { %523 = vmatmul.mubr.msk.f32.vlgmr.msra.gmra.mxu1 %vm253_vm1, %v36_v57 }
  0xe8   :  { %525 = vmatprep.mubr.msk.f32.mxu1 %vm253_vm1, %v37_v58 }
  0xeb   :  { %526 = vmatmul.mubr.msk.f32.gmra.mxu1 %vm253_vm1, %v38_v59 }
 0x1a7   :  { %v524_v62 = vpop.f32.mrf.mxu1 }
 0x1a8   :  { %v338_v5 = vadd.f32 %v524_v62, %v241_v3 }
 0x1a9   :  { %v332_v0 = vpop.f32.mrf.mxu1 }
 0x1aa   :  { %v333_v9 = vadd.f32 %v332_v0, %v236_v8  ;;  %v352_v11 = vmax.f32 %v338_v5, 0.0 }
 0x1ab   :  { %v527_v1 = vpop.f32.mrf.mxu1 }
 0x1ac   :  { %v348_v2 = vadd.f32 %v527_v1, %v251_v61  ;;  %v351_v12 = vmax.f32 %v333_v9, 0.0 }
 0x1ad   :  { %v342_v4 = vpop.f32.mrf.mxu1 }
 0x1ae   :  { %v354_v6 = vmax.f32 %v348_v2, 0.0  ;;  %v343_v7 = vadd.f32 %v342_v4, %v246_v63 }
 0x1b0   :  { %v353_v10 = vmax.f32 %v343_v7, 0.0  ;;  %529 = vmatpush3.msra.mxu0 %v354_v6 }
 0x1b1   :  { %530 = vmatprep.subr.mxu0 %v568_v60 }
 0x1b2   :  { %531 = vmatpush3.msra.mxu0 %v353_v10 }
 0x1b3   :  { %532 = vmatprep.subr.mxu0 %v568_v60 }
 0x1b4   :  { %533 = vmatpush3.msra.mxu0 %v352_v11 }
 0x1b5   :  { %534 = vmatprep.subr.mxu0 %v568_v60 }
 0x1b6   :  { %535 = vmatpush3.msra.mxu0 %v351_v12 }
 0x1b7   :  { %537 = vmatmul.mubr.msk.f32.vlgmr.msra.gmra.mxu0 %vm360_vm3, %v39_v13 }
 0x277   :  { %v430_v15 = vpop.f32.mrf.mxu0 }
 0x278   :  { %v431_v16 = vadd.f32 %v430_v15, %v358_v14 }
 0x279   :  { %v538_v17 = vpop.f32.mrf.mxu0 }
 0x27a   :  { %435 = vst.msk [vmem:[#allocation2] sm:$0x7] %vm434_vm4, %v431_v16 }
 0x27b   :  { %556 = shalt.err (!%p553_p4)
}
 0x27c   :  { %445 = dma.vmem_to_hbm [thread:$0]  %s443_s28, 64, %s717_s7, [#allocation3]  }
 0x27d   :  { %565 = dma.done.wait [#allocation3], 64  }
 0x27e   :  { %566 = vsyncadd [#allocation3], 4294967232 }
 0x27f   :  { %449 = vsyncpa [#allocation3], 1 }

</bundles_post_ra>
